<compile_context>
chip_gen: v7x
topology: tpu7x:2x2x1
jax: 0.10.0
libtpu: 0.0.40
codegen_flags: <defaults>
</compile_context>

<pallas_src>
import math
import functools

import jax
import jax.numpy as jnp
import numpy as np
from jax.experimental import pallas as pl
from jax.experimental.pallas import tpu as pltpu


# ---------------------------------------------------------------------------
# small helpers
# ---------------------------------------------------------------------------

def _pick_tile(dim, candidates):
    """Largest candidate tile that evenly divides `dim`; else use the full dim."""
    for t in candidates:
        if dim >= t and dim % t == 0:
            return t
    return dim


def _round_up(x, m):
    return ((x + m - 1) // m) * m


def _vmem_limit(nbytes):
    """vmem_limit_bytes from a tile-footprint estimate: 2x margin + 4 MiB headroom,
    floor 32 MiB (protects against under-estimation), cap 96 MiB."""
    return int(min(max(2 * nbytes + (4 << 20), 32 << 20), 96 << 20))


# ---------------------------------------------------------------------------
# Tiled linear (x @ w + b) kernel — bf16 operands staged in HBM, f32 accumulation.
# ---------------------------------------------------------------------------

def _linear_kernel(x_ref, w_ref, b_ref, o_ref, acc_ref):
    @pl.when(pl.program_id(2) == 0)
    def _():
        acc_ref[...] = jnp.zeros_like(acc_ref)

    # Operands arrive already in their compute dtype (bf16) — no in-kernel casts.
    acc_ref[...] += jnp.dot(x_ref[...], w_ref[...], preferred_element_type=jnp.float32)

    @pl.when(pl.program_id(2) == pl.num_programs(2) - 1)
    def _():
        o_ref[...] = (acc_ref[...] + b_ref[...].astype(jnp.float32)).astype(o_ref.dtype)


def linear_pallas(x2d, w, b, out_dtype=jnp.float32):
    """y = x2d @ w + b ; x2d: (M, K), w: (K, N), b: (N,)."""
    M, K = x2d.shape
    N = w.shape[1]
    tm = _pick_tile(M, (256, 128))                 # full-M block for small test shapes
    tn = _pick_tile(N, (1024, 512, 256, 128))      # 256-multiples preferred (v6e/v7x MXU)
    tk = _pick_tile(K, (512, 256, 128))
    grid = (M // tm, N // tn, K // tk)

    bx = jnp.dtype(x2d.dtype).itemsize
    bw = jnp.dtype(w.dtype).itemsize
    bo = jnp.dtype(out_dtype).itemsize
    footprint = 2 * (tm * tk * bx + tk * tn * bw + tn * 4 + tm * tn * bo) + tm * tn * 4

    return pl.pallas_call(
        _linear_kernel,
        out_shape=jax.ShapeDtypeStruct((M, N), out_dtype),
        grid=grid,
        in_specs=[pl.BlockSpec((tm, tk), lambda i, j, k: (i, k)),
                  pl.BlockSpec((tk, tn), lambda i, j, k: (k, j)),
                  pl.BlockSpec((1, tn), lambda i, j, k: (0, j))],
        out_specs=pl.BlockSpec((tm, tn), lambda i, j, k: (i, j)),
        scratch_shapes=[pltpu.VMEM((tm, tn), jnp.float32)],
        compiler_params=pltpu.CompilerParams(
            dimension_semantics=("parallel", "parallel", "arbitrary"),
            vmem_limit_bytes=_vmem_limit(footprint)),
    )(x2d, w, b.reshape(1, N).astype(jnp.float32))


# ---------------------------------------------------------------------------
# Flash-style attention kernel: grid=(B, Tm_pad/tk), all heads fused per step,
# online-softmax state in VMEM scratch, key memory pre-transposed to (C, Tm).
# ---------------------------------------------------------------------------

def _flash_attn_kernel(*refs, n_head, has_bias):
    if has_bias:
        q_ref, kT_ref, v_ref, b_ref, o_ref, m_sc, l_sc, acc_sc = refs
    else:
        q_ref, kT_ref, v_ref, o_ref, m_sc, l_sc, acc_sc = refs
        b_ref = None

    kv = pl.program_id(1)
    T, C = q_ref.shape          # q block (q is pre-scaled by 1/sqrt(hd) via w_attn folding)
    tk = kT_ref.shape[1]
    hd = C // n_head

    @pl.when(kv == 0)
    def _():
        m_sc[...] = jnp.full_like(m_sc, -1e30)
        l_sc[...] = jnp.zeros_like(l_sc)
        acc_sc[...] = jnp.zeros_like(acc_sc)

    q = q_ref[...]              # (T, C)     bf16
    kT = kT_ref[...]            # (C, tk)    bf16 (K transposed -> native matmul form)
    v = v_ref[...]              # (tk, C)    bf16

    if b_ref is None:
        # Memory-prefix causal mask (tril(block,block)[:T,:Tm]): key j visible to query i
        # iff j <= i.  Generated from iota — never materialized in HBM.  Padded key
        # columns (j >= Tm >= T > i) are masked by the same condition.
        row = jax.lax.broadcasted_iota(jnp.int32, (T, tk), 0)
        col = jax.lax.broadcasted_iota(jnp.int32, (T, tk), 1) + kv * tk
        causal_bias = jnp.where(col <= row, 0.0, -1e30).astype(jnp.float32)

    # TODO(synk): switch to lax.fori_loop + lane-aligned head tiles once hd % 128 == 0.
    for h in range(n_head):
        sl = slice(h * hd, (h + 1) * hd)
        qh = q[:, sl]           # (T, hd)
        kh = kT[sl, :]          # (hd, tk)  — sublane slice, no lane relayout
        vh = v[:, sl]           # (tk, hd)

        # s = q @ k^T, f32 accumulation on the MXU (scale already folded into q).
        s = jnp.dot(qh, kh, preferred_element_type=jnp.float32)      # (T, tk) f32
        if b_ref is not None:
            s = s + b_ref[h].astype(jnp.float32)   # pre-folded causal+user+pad bias
        else:
            s = s + causal_bias

        m_prev = m_sc[h]                                             # (T, 1)
        m_new = jnp.maximum(m_prev, jnp.max(s, axis=-1, keepdims=True))
        alpha = jnp.exp(m_prev - m_new)
        p = jnp.exp(s - m_new)                                       # (T, tk) f32
        l_sc[h] = alpha * l_sc[h] + jnp.sum(p, axis=-1, keepdims=True)
        acc_sc[h] = alpha * acc_sc[h] + jnp.dot(p.astype(v.dtype), vh,
                                                preferred_element_type=jnp.float32)
        m_sc[h] = m_new

    @pl.when(kv == pl.num_programs(1) - 1)
    def _():
        # Per-head writes go to the VMEM output buffer once per batch element; the HBM
        # writeback is a single lane-dense (T, C) block DMA.
        for h in range(n_head):
            inv_l = pl.reciprocal(l_sc[h], approx=True)              # EUP slot
            o_ref[:, h * hd:(h + 1) * hd] = (acc_sc[h] * inv_l).astype(o_ref.dtype)


def attention_pallas(q_arr, kT, v, n_head, bias=None, out_dtype=jnp.bfloat16):
    """q_arr: (B, T, C) or packed (B, T, 3C) with q in the first C columns (pre-scaled);
    kT: (B, C, Tm_pad); v: (B, Tm_pad, C); bias: optional additive (B, nH, T, Tm_pad)."""
    B, T = q_arr.shape[0], q_arr.shape[1]
    C, Tm_pad = kT.shape[1], kT.shape[2]
    hd = C // n_head
    tk = _pick_tile(Tm_pad, (512, 256, 128))       # Tm_pad is a multiple of 128
    n_kv = Tm_pad // tk
    has_bias = bias is not None

    in_specs = [
        pl.BlockSpec((None, T, C), lambda b, kv: (b, 0, 0)),    # q (block 0 of a 3C buffer)
        pl.BlockSpec((None, C, tk), lambda b, kv: (b, 0, kv)),  # K^T tile
        pl.BlockSpec((None, tk, C), lambda b, kv: (b, kv, 0)),  # V tile
    ]
    args = [q_arr, kT, v]
    if has_bias:
        in_specs.append(pl.BlockSpec((None, n_head, T, tk), lambda b, kv: (b, 0, 0, kv)))
        args.append(bias)

    bo = jnp.dtype(out_dtype).itemsize
    footprint = (T * C * 2                         # q (resident)
                 + 2 * (C * tk * 2 + tk * C * 2)   # double-buffered K^T / V tiles
                 + 2 * T * C * bo                  # output block
                 + (2 * n_head * T + n_head * T * hd) * 4)   # m / l / acc scratch
    if has_bias:
        footprint += 2 * n_head * T * tk * jnp.dtype(bias.dtype).itemsize

    kernel = functools.partial(_flash_attn_kernel, n_head=n_head, has_bias=has_bias)
    return pl.pallas_call(
        kernel,
        out_shape=jax.ShapeDtypeStruct((B, T, C), out_dtype),
        grid=(B, n_kv),
        in_specs=in_specs,
        out_specs=pl.BlockSpec((None, T, C), lambda b, kv: (b, 0, 0)),
        scratch_shapes=[pltpu.VMEM((n_head, T, 1), jnp.float32),   # running max
                        pltpu.VMEM((n_head, T, 1), jnp.float32),   # running denom
                        pltpu.VMEM((n_head, T, hd), jnp.float32)], # output accumulator
        compiler_params=pltpu.CompilerParams(
            dimension_semantics=("parallel", "arbitrary"),
            vmem_limit_bytes=_vmem_limit(footprint)),
    )(*args)


# ---------------------------------------------------------------------------
# Pure-JAX references (correctness check) and glue ops
# ---------------------------------------------------------------------------

def linear_ref(x2d, w, b, out_dtype=jnp.float32):
    return (x2d @ w + b[None, :]).astype(out_dtype)


def attention_ref(q, k, v, scale, n_head, block_size, attn_mask=None):
    B, T, C = q.shape
    Tm = k.shape[1]
    hd = C // n_head
    qh = q.reshape(B, T, n_head, hd).transpose(0, 2, 1, 3)
    kh = k.reshape(B, Tm, n_head, hd).transpose(0, 2, 1, 3)
    vh = v.reshape(B, Tm, n_head, hd).transpose(0, 2, 1, 3)
    s = jnp.einsum('bhqd,bhkd->bhqk', qh, kh) * scale
    causal = jnp.tril(jnp.ones((block_size, block_size), jnp.float32))[:T, :Tm]
    mask = causal[None, None]
    if attn_mask is not None:
        mask = mask * attn_mask
    s = jnp.where(mask == 0, -jnp.inf, s)
    p = jax.nn.softmax(s, axis=-1)
    y = jnp.einsum('bhqk,bhkd->bhqd', p, vh)
    return y.transpose(0, 2, 1, 3).reshape(B, T, C)


def depthwise_conv1d_k2s2p1_time(x, w):
    """nn.Conv1d(hd, hd, kernel_size=2, stride=2, padding=1, groups=hd, bias=False)
    applied along time; x: (B, T, nH, hd) channels-last, w: (hd, 2)."""
    B, T, nH, hd = x.shape
    xp = jnp.pad(x, ((0, 0), (1, 1), (0, 0), (0, 0)))
    T_out = (T + 2 - 2) // 2 + 1
    x0 = xp[:, 0:2 * T_out:2]
    x1 = xp[:, 1:2 * T_out:2]
    return x0 * w[:, 0] + x1 * w[:, 1]


def layernorm(x, gamma, beta, eps=1e-5):
    mu = jnp.mean(x, axis=-1, keepdims=True)
    var = jnp.mean((x - mu) ** 2, axis=-1, keepdims=True)
    return (x - mu) / jnp.sqrt(var + eps) * gamma + beta


# ---------------------------------------------------------------------------
# Module
# ---------------------------------------------------------------------------

class MemoryCausalSelfAttention:
    def __init__(self, params, n_head, n_embd, block_size, use_pallas=True):
        assert n_embd % n_head == 0
        self.p = params
        self.n_head = n_head
        self.n_embd = n_embd
        self.head_dim = n_embd // n_head
        self.block_size = block_size
        self.use_pallas = use_pallas
        self.scale = 1.0 / math.sqrt(self.head_dim)
        # K/V memory cache kept channels-last (B, T_i, C); bf16 on the Pallas path.
        self.cached_k = []
        self.cached_v = []
        self.cached_video_names = []
        self.max_mem = 4
        self.enable_compression = True
        # attn_dropout / resid_dropout: dropout prob 0.0 -> identity.

        if use_pallas:
            # Fold the attention scale into the q columns of w_attn / b_attn and stage the
            # weights in bf16 (HBM compute dtype) once, at construction time.
            w_attn, b_attn = params['w_attn'], params['b_attn']
            w_attn_s = jnp.concatenate(
                [w_attn[:, :n_embd] * self.scale, w_attn[:, n_embd:]], axis=1)
            b_attn_s = jnp.concatenate(
                [b_attn[:n_embd] * self.scale, b_attn[n_embd:]])
            self.w_attn_c = w_attn_s.astype(jnp.bfloat16)
            self.b_attn_c = b_attn_s.astype(jnp.float32)
            self.w_proj_c = params['w_proj'].astype(jnp.bfloat16)
            self.b_proj_c = params['b_proj'].astype(jnp.float32)

    def clear_memory(self):
        self.cached_k.clear()
        self.cached_v.clear()
        self.cached_video_names.clear()

    def compress_fn(self, k_unc, v_unc):
        B, T, C = k_unc.shape
        nH, hd = self.n_head, self.head_dim

        def comp(x, w_conv, g, bta):
            dt = x.dtype
            x = x.astype(jnp.float32).reshape(B, T, nH, hd)
            x = depthwise_conv1d_k2s2p1_time(x, w_conv)
            x = layernorm(x, g, bta)
            return x.reshape(B, -1, C).astype(dt)

        k_out = comp(k_unc, self.p['compress_k_w'], self.p['ln_k_g'], self.p['ln_k_b'])
        v_out = comp(v_unc, self.p['compress_v_w'], self.p['ln_v_g'], self.p['ln_v_b'])
        return k_out, v_out

    def forward(self, x, attn_mask=None, video_names=None):
        B, T, C = x.shape
        nH, hd = self.n_head, self.head_dim

        # qkv projection.
        if self.use_pallas:
            qkv = linear_pallas(x.reshape(B * T, C).astype(jnp.bfloat16),
                                self.w_attn_c, self.b_attn_c, out_dtype=jnp.bfloat16)
        else:
            qkv = linear_ref(x.reshape(B * T, C), self.p['w_attn'], self.p['b_attn'],
                             out_dtype=jnp.float32)
        qkv = qkv.reshape(B, T, 3 * C)
        k_new = qkv[:, :, C:2 * C]            # (B, T, C) channels-last (unscaled)
        v_new = qkv[:, :, 2 * C:]

        # Host-side video-name based memory invalidation.
        if len(self.cached_video_names) > 0:
            old_vids = self.cached_video_names[-1]
            if video_names is not None and old_vids is not None:
                for i in range(B):
                    if video_names[i] not in old_vids:
                        self.clear_memory()
                        break

        if self.enable_compression and len(self.cached_k) > 0:
            k_c, v_c = self.compress_fn(self.cached_k[-1], self.cached_v[-1])
            self.cached_k[-1] = jax.lax.stop_gradient(k_c)
            self.cached_v[-1] = jax.lax.stop_gradient(v_c)

        self.cached_k.append(jax.lax.stop_gradient(k_new))
        self.cached_v.append(jax.lax.stop_gradient(v_new))
        self.cached_video_names.append(video_names)
        while len(self.cached_k) > self.max_mem:
            self.cached_k.pop(0)
            self.cached_v.pop(0)
            self.cached_video_names.pop(0)

        all_k = jnp.concatenate(self.cached_k, axis=1)   # (B, T_mem, C)
        all_v = jnp.concatenate(self.cached_v, axis=1)
        T_mem = all_k.shape[1]
        used_T = min(T, self.block_size)
        used_T_mem = min(T_mem, self.block_size)
        am = attn_mask[:, :, :used_T, :used_T_mem] if attn_mask is not None else None

        if self.use_pallas:
            # Pad the key axis to a multiple of 128 and present K transposed (B, C, Tm_pad).
            Tm_pad = _round_up(used_T_mem, 128)
            pad_m = Tm_pad - used_T_mem
            kT = jnp.swapaxes(all_k[:, :used_T_mem], 1, 2)
            kT = jnp.pad(kT, ((0, 0), (0, 0), (0, pad_m)))
            v_p = jnp.pad(all_v[:, :used_T_mem], ((0, 0), (0, pad_m), (0, 0)))

            if am is not None:
                # Fold causal + user mask + key padding into one additive bf16 bias.
                causal = jnp.tril(jnp.ones((self.block_size, self.block_size),
                                           jnp.float32))[:used_T, :used_T_mem]
                keep = causal[None, None] * am
                bias = jnp.where(keep != 0, 0.0, -1e30).astype(jnp.float32)
                bias = jnp.pad(bias, ((0, 0), (0, 0), (0, 0), (0, pad_m)),
                               constant_values=-1e30).astype(jnp.bfloat16)
            else:
                bias = None   # causal mask generated in-kernel (no HBM mask tensor)

            if used_T == T and C % 128 == 0:
                q_in = qkv                      # read q in place from the packed buffer
            else:
                q_in = qkv[:, :used_T, :C]      # fallback: explicit slice
            y = attention_pallas(q_in, kT, v_p, nH, bias=bias, out_dtype=jnp.bfloat16)
        else:
            q = qkv[:, :, :C]
            y = attention_ref(q[:, :used_T], all_k[:, :used_T_mem], all_v[:, :used_T_mem],
                              self.scale, nH, self.block_size, attn_mask=am)

        if self.use_pallas:
            y = linear_pallas(y.reshape(B * used_T, C), self.w_proj_c, self.b_proj_c,
                              out_dtype=jnp.float32)
        else:
            y = linear_ref(y.reshape(B * used_T, C), self.p['w_proj'], self.p['b_proj'],
                           out_dtype=jnp.float32)
        return y.reshape(B, used_T, C)


# ---------------------------------------------------------------------------
# Deterministic synthetic parameter init (weights stored as (in, out), i.e.
# already transposed relative to PyTorch's nn.Linear (out, in) convention).
# ---------------------------------------------------------------------------

def init_params(key, n_embd, n_head):
    hd = n_embd // n_head
    ks = jax.random.split(key, 6)
    return {
        'w_attn': 0.02 * jax.random.normal(ks[0], (n_embd, 3 * n_embd), jnp.float32),
        'b_attn': 0.02 * jax.random.normal(ks[1], (3 * n_embd,), jnp.float32),
        'w_proj': 0.02 * jax.random.normal(ks[2], (n_embd, n_embd), jnp.float32),
        'b_proj': 0.02 * jax.random.normal(ks[3], (n_embd,), jnp.float32),
        'compress_k_w': 0.1 * jax.random.normal(ks[4], (hd, 2), jnp.float32),
        'compress_v_w': 0.1 * jax.random.normal(ks[5], (hd, 2), jnp.float32),
        'ln_k_g': jnp.ones((hd,), jnp.float32),   # LayerNorm defaults (weight=1)
        'ln_k_b': jnp.zeros((hd,), jnp.float32),  # LayerNorm defaults (bias=0)
        'ln_v_g': jnp.ones((hd,), jnp.float32),
        'ln_v_b': jnp.zeros((hd,), jnp.float32),
    }


if __name__ == "__main__":
    key = jax.random.PRNGKey(0)
    B, T, n_embd, n_head, block_size = 2, 8, 128, 4, 32
    kp, kx1, kx2 = jax.random.split(key, 3)
    params = init_params(kp, n_embd, n_head)

    attn_pl = MemoryCausalSelfAttention(params, n_head, n_embd, block_size, use_pallas=True)
    attn_rf = MemoryCausalSelfAttention(params, n_head, n_embd, block_size, use_pallas=False)

    x1 = jax.random.normal(kx1, (B, T, n_embd), jnp.float32)
    x2 = jax.random.normal(kx2, (B, T, n_embd), jnp.float32)

    # Call 1: empty memory -> plain causal self-attention over T keys.
    y1 = attn_pl.forward(x1)
    y1_ref = attn_rf.forward(x1)
    # Call 2: previous K/V get compressed (depthwise conv + LN) and concatenated,
    # so attention runs over T_mem = T//2 + 1 + T memory keys (ragged -> padded to 128).
    y2 = attn_pl.forward(x2)
    y2_ref = attn_rf.forward(x2)

    jax.block_until_ready((y1, y2))
    assert y1.shape == (B, T, n_embd) and y2.shape == (B, T, n_embd)
    # Pallas path uses bf16 MXU operands / bf16 K-V cache (f32 accumulation + f32 softmax),
    # so compare against the pure-f32 reference with bf16-level tolerance.
    np.testing.assert_allclose(np.asarray(y1), np.asarray(y1_ref), rtol=3e-2, atol=3e-3)
    np.testing.assert_allclose(np.asarray(y2), np.asarray(y2_ref), rtol=3e-2, atol=3e-3)
    print("KERNEL_OK")
</pallas_src>

<mosaic_0001>
module attributes {stable_mosaic.version = 11 : i64} {
  func.func @_linear_kernel(%arg0: i32, %arg1: i32, %arg2: i32, %arg3: memref<16x128xbf16, #tpu.memory_space<vmem>>, %arg4: memref<128x128xbf16, #tpu.memory_space<vmem>>, %arg5: memref<1x128xf32, #tpu.memory_space<vmem>>, %arg6: memref<16x128xbf16, #tpu.memory_space<vmem>>, %arg7: memref<16x128xf32, #tpu.memory_space<vmem>>) attributes {dimension_semantics = [#tpu.dimension_semantics<parallel>, #tpu.dimension_semantics<parallel>, #tpu.dimension_semantics<arbitrary>], iteration_bounds = array<i64: 1, 3, 1>, scalar_prefetch = 0 : i64, scratch_operands = 1 : i64, tpu.core_type = #tpu.core_type<tc>, window_params = [{transform_indices = @transform_0, window_bounds = array<i64: 16, 128>}, {transform_indices = @transform_1, window_bounds = array<i64: 128, 128>}, {transform_indices = @transform_2, window_bounds = array<i64: 1, 128>}, {transform_indices = @transform_3, window_bounds = array<i64: 16, 128>}]} {
    %c0_i32 = arith.constant 0 : i32
    %0 = arith.cmpi eq, %arg2, %c0_i32 : i32
    %1 = arith.extui %0 : i1 to i32
    %c0_i32_0 = arith.constant 0 : i32
    %2 = arith.cmpi ne, %1, %c0_i32_0 : i32
    scf.if %2 {
      %cst_10 = arith.constant 0.000000e+00 : f32
      %12 = vector.broadcast %cst_10 : f32 to vector<16x128xf32>
      %c0_11 = arith.constant 0 : index
      %c0_12 = arith.constant 0 : index
      %13 = vector.load %arg7[%c0_11, %c0_12] : memref<16x128xf32, #tpu.memory_space<vmem>>, vector<16x128xf32>
      tpu.vector_store %arg7[%c0_11, %c0_12], %12 {strides = array<i32>} : memref<16x128xf32, #tpu.memory_space<vmem>>, vector<16x128xf32>,
    } else {
    }
    %c0 = arith.constant 0 : index
    %c0_1 = arith.constant 0 : index
    %3 = vector.load %arg7[%c0, %c0_1] : memref<16x128xf32, #tpu.memory_space<vmem>>, vector<16x128xf32>
    %c0_2 = arith.constant 0 : index
    %c0_3 = arith.constant 0 : index
    %4 = vector.load %arg3[%c0_2, %c0_3] : memref<16x128xbf16, #tpu.memory_space<vmem>>, vector<16x128xbf16>
    %c0_4 = arith.constant 0 : index
    %c0_5 = arith.constant 0 : index
    %5 = vector.load %arg4[%c0_4, %c0_5] : memref<128x128xbf16, #tpu.memory_space<vmem>>, vector<128x128xbf16>
    %cst = arith.constant dense<0.000000e+00> : vector<16x128xf32>
    %6 = tpu.matmul %4, %5, %cst {dimension_numbers = #tpu.dot_dimension_numbers<[1], [0], [0], [1], [0, 0, 1, 1], [], []>} : vector<16x128xbf16>, vector<128x128xbf16>, vector<16x128xf32> -> vector<16x128xf32>
    %7 = arith.addf %3, %6 : vector<16x128xf32>
    %c0_6 = arith.constant 0 : index
    %c0_7 = arith.constant 0 : index
    %8 = vector.load %arg7[%c0_6, %c0_7] : memref<16x128xf32, #tpu.memory_space<vmem>>, vector<16x128xf32>
    tpu.vector_store %arg7[%c0_6, %c0_7], %7 {strides = array<i32>} : memref<16x128xf32, #tpu.memory_space<vmem>>, vector<16x128xf32>,
    %c0_i32_8 = arith.constant 0 : i32
    %9 = arith.cmpi eq, %arg2, %c0_i32_8 : i32
    %10 = arith.extui %9 : i1 to i32
    %c0_i32_9 = arith.constant 0 : i32
    %11 = arith.cmpi ne, %10, %c0_i32_9 : i32
    scf.if %11 {
      %c0_10 = arith.constant 0 : index
      %c0_11 = arith.constant 0 : index
      %12 = vector.load %arg7[%c0_10, %c0_11] : memref<16x128xf32, #tpu.memory_space<vmem>>, vector<16x128xf32>
      %c0_12 = arith.constant 0 : index
      %c0_13 = arith.constant 0 : index
      %13 = vector.load %arg5[%c0_12, %c0_13] : memref<1x128xf32, #tpu.memory_space<vmem>>, vector<1x128xf32>
      %14 = vector.broadcast %13 : vector<1x128xf32> to vector<16x128xf32>
      %15 = arith.addf %12, %14 : vector<16x128xf32>
      %16 = arith.truncf %15 : vector<16x128xf32> to vector<16x128xbf16>
      %c0_14 = arith.constant 0 : index
      %c0_15 = arith.constant 0 : index
      %17 = vector.load %arg6[%c0_14, %c0_15] : memref<16x128xbf16, #tpu.memory_space<vmem>>, vector<16x128xbf16>
      tpu.vector_store %arg6[%c0_14, %c0_15], %16 {strides = array<i32>} : memref<16x128xbf16, #tpu.memory_space<vmem>>, vector<16x128xbf16>,
    } else {
    }
    return
  }
  func.func @transform_0(%arg0: i32, %arg1: i32, %arg2: i32) -> (i32, i32) {
    %c0_i32 = arith.constant 0 : i32
    return %arg0, %arg2 : i32, i32
  }
  func.func @transform_1(%arg0: i32, %arg1: i32, %arg2: i32) -> (i32, i32) {
    %c0_i32 = arith.constant 0 : i32
    return %arg2, %arg1 : i32, i32
  }
  func.func @transform_2(%arg0: i32, %arg1: i32, %arg2: i32) -> (i32, i32) {
    %c0_i32 = arith.constant 0 : i32
    %c0_i32_0 = arith.constant 0 : i32
    return %c0_i32, %arg1 : i32, i32
  }
  func.func @transform_3(%arg0: i32, %arg1: i32, %arg2: i32) -> (i32, i32) {
    %c0_i32 = arith.constant 0 : i32
    return %arg0, %arg1 : i32, i32
  }
}

</mosaic_0001>

<bundles_post_ra>
// kernel: tpu_custom_call.1
= control target key start
LH: loop header
LB: loop body
LE: loop exit
PB: predicated region body
PF: predicated region fallthrough
CT: control target
= control target key end

     0   :  { %8 = vsyncpa [#allocation4], 0  ;;  %s1088_s0 = inlined_call_operand.hbm [shape: bf16[16,128], index: 0, kind: input, shape index: {}]   ;;  %s1089_s1 = inlined_call_operand.hbm [shape: bf16[128,384], index: 1, kind: input, shape index: {}]   ;;  %s1090_s2 = inlined_call_operand.vmem [shape: f32[1,384], index: 2, kind: input, shape index: {}]   ;;  %s1091_s3 = inlined_call_operand.hbm [shape: bf16[16,384], index: 3, kind: output, shape index: {}]  }
   0x1   :  { %9 = vsyncpa [#allocation7], 0 }
   0x2   :  { %11 = vsyncpa [#allocation7 + $0x1], 0 }
   0x3   :  { %12 = vsyncpa [#allocation5], 0 }
   0x4   :  { %14 = vsyncpa [#allocation5 + $0x1], 0  ;;  %s866_s12 = smov 0   ;;  %s868_s13 = smov 0  }
   0x5   :  { %s870_s14 = smov 0   ;;  %s872_s15 = smov 0  }
   0x6   :  { %s874_s16 = smov 0   ;;  %s876_s17 = smov 0  }
   0x7 LB: > { %s536_s18 = sadd.s32 4294967295, %s833_s17   ;;  %s537_s19 = sadd.s32 4294967294, %s833_s17   ;;  %s833_s17 = sphi %s876_s17, %s20_s17   ;;  %s829_s16 = sphi %s874_s16, %s1118_s16   ;;  %s825_s15 = sphi %s872_s15, %s1117_s15   ;;  %s821_s14 = sphi %s870_s14, %s1116_s14   ;;  %s817_s13 = sphi %s868_s13, %s1115_s13   ;;  %s813_s12 = sphi %s866_s12, %s1114_s12  }
   0x8   : > { %p83_p0 = scmp.ne.s32.totalorder %s821_s14, %s817_s13  ;;  %p84_p1 = scmp.eq.s32.totalorder %s833_s17, 0 }
   0x9   : > { %p89_p2 = scmp.ne.s32.totalorder %s817_s13, %s813_s12  ;;  %p903_p3 = scmp.eq.s32.totalorder %s536_s18, 0 }
   0xa   : > { %p907_p4 = por %p84_p1, %p83_p0  ;;  %p141_p5 = scmp.eq.s32.totalorder %s536_s18, 2 }
   0xb   : > { %s1099_s20 = scalar_select %p903_p3, 1, 0 }
   0xc   : > { %p913_p6 = por %p903_p3, %p89_p2  ;;  %p147_p7 = scmp.eq.s32.totalorder %s537_s19, 2 }
   0xd   : > { %p917_p8 = por %p141_p5, %p83_p0  ;;  %p538_p9 = scmp.ge.s32.totalorder %s833_s17, 1 }
   0xe   : > { %s1101_s22 = scalar_select %p913_p6, 1, 0 }
   0xf   : > { %s1102_s23 = scalar_select %p917_p8, 1, 0 }
  0x10   : > { %p922_p10 = por %p147_p7, %p89_p2  ;;  %p154_p11 = scmp.lt.s32.totalorder %s833_s17, 4 }
  0x11   : > { %s835_s26 = smov [#allocation3]   ;;  %p620_p0 = scmp.lt.s32.totalorder %s833_s17, 3 }
  0x12   : > { %s1103_s24 = scalar_select %p922_p10, 1, 0 }
  0x13   : > { %p927_p12 = pnand %p538_p9, %p154_p11  ;;  %s170_s27 = sshll.u32 %s835_s26, 4  ;;  %s171_s27 = int_to_ptr.vmem [resolvable:$true] %s170_s27 }
  0x14   : > { %p942_p2 = pnand %p620_p0, %p907_p4  ;;  %s35_s30 = sadd.s32 1, %s829_s16 }
  0x15   : > { %s1104_s25 = scalar_select %p927_p12, 1, 0 }
  0x16   : > { %p607_p13 = pneg %p927_p12  ;;  %s689_s6 = scalar_lea.hbm %s1088_s0, 128 }
  0x17   : > { %s1106_s29 = scalar_select %p942_p2, 1, 0 }
  0x18   : > { %p936_p1 = pnand %p607_p13, %p903_p3  ;;  %p690_p5 = scmp.ne.s32.totalorder %s1088_s0, %s689_s6 }
  0x19   : > { %p696_p4 = scmp.lt.u32.totalorder %s689_s6, %s1088_s0 }
  0x1a   : > { %p691_p7 = pneg %p936_p1 }
  0x1c   : > { %p692_p9 = pnand %p691_p7, %p690_p5 }
  0x1e   : > { %p693_p11 = pneg %p692_p9 }
  0x20   : > { %p698_p13 = pnand %p696_p4, %p693_p11 }
  0x22   : > { %701 = shalt.err (!%p698_p13)
}
  0x23   : > { %s702_s11 = scalar_lea.vmem %s171_s27, 128  ;;  %p710_p6 = scmp.lt.s32.totalorder %s171_s27, %s171_s27 }
  0x24   : > { %p703_p0 = scmp.ne.s32.totalorder %s171_s27, %s702_s11  ;;  %p711_p3 = scmp.lt.s32.totalorder %s702_s11, %s702_s11 }
  0x26   : > { %p705_p10 = pnand %p703_p0, %p691_p7  ;;  %p712_p12 = por %p711_p3, %p710_p6 }
  0x28   : > { %p706_p8 = pneg %p705_p10 }
  0x2a   : > { %p713_p2 = pnand %p712_p12, %p706_p8 }
  0x2c   : > { %716 = shalt.err (!%p713_p2)
}
  0x2d   : > { %s1098_s18 = smov 64   ;;  %s837_s19 = smov 4  }
  0x2e   : > { %610 = dma.hbm_to_vmem [thread:$0]  (!%p936_p1), %s1088_s0, 128, %s171_s27, [#allocation4], %s1098_s18, %s1098_s18, %s837_s19  }
  0x2f   : > { %p37_p10 = scmp.ge.s32.totalorder %s35_s30, 3  ;;  %s76_s4 = sadd.s32 1, %s821_s14 }
  0x30   : > { %s184_s5 = sand.u32 1, %s821_s14   ;;  %s542_s8 = sshll.u32 %s829_s16, 6 }
  0x31   : > { %s1120_s30 = smov (%p37_p10, %s35_s30), 0  ;;  %s541_s6 = sshll.u32 %s184_s5, 6 }
  0x32   : > { %s72_s7 = ssub.s32 %s829_s16, %s1120_s30  ;;  %s976_s10 = scalar_lea.hbm %s1089_s1, %s542_s8 }
  0x33   : > { %p74_p3 = scmp.eq.s32.totalorder %s72_s7, 0  ;;  %s188_s27 = scalar_lea.vmem [#allocation6], %s541_s6 }
  0x34   : > { %s197_s11 = sshll.u32 %s188_s27, 4  ;;  %s983_s26 = scalar_lea.sflag [#allocation7], %s184_s5  ;;  %s981_s11 = int_to_ptr.vmem [resolvable:$true] %s197_s11 }
  0x35   : > { %s979_s21 = scalar_select %p74_p3, %s821_s14, %s76_s4  }
  0x36   : > { %s717_s18 = scalar_lea.hbm %s976_s10, 1024  ;;  %p1107_p8 = scmp.ne.s32.totalorder %s1106_s29, 0 }
  0x37   : > { %p718_p6 = scmp.ne.s32.totalorder %s976_s10, %s717_s18  ;;  %s722_s28 = scalar_lea.hbm %s1089_s1, 3072 }
  0x38   : > { %p719_p12 = pneg %p1107_p8  ;;  %p723_p5 = scmp.lt.u32.totalorder %s976_s10, %s1089_s1 }
  0x39   : > { %p724_p7 = scmp.lt.u32.totalorder %s722_s28, %s717_s18  ;;  %p726_p11 = scmp.lt.u32.totalorder %s717_s18, %s976_s10 }
  0x3a   : > { %p720_p1 = pnand %p719_p12, %p718_p6 }
  0x3b   : > { %p725_p9 = por %p724_p7, %p723_p5 }
  0x3c   : > { %p721_p2 = pneg %p720_p1 }
  0x3d   : > { %p727_p4 = por %p726_p11, %p725_p9 }
  0x3f   : > { %p728_p13 = pnand %p727_p4, %p721_p2 }
  0x41   : > { %731 = shalt.err (!%p728_p13)
}
  0x42   : > { %s732_s4 = scalar_lea.vmem %s981_s11, 1024  ;;  %s838_s5 = smov [#allocation6]  }
  0x43   : > { %p733_p0 = scmp.ne.s32.totalorder %s981_s11, %s732_s4  ;;  %s737_s27 = sshll.u32 %s838_s5, 4  ;;  %s738_s27 = int_to_ptr.vmem [resolvable:$false] %s737_s27 }
  0x44   : > { %s739_s7 = scalar_lea.vmem %s738_s27, 2048  ;;  %p740_p6 = scmp.lt.s32.totalorder %s981_s11, %s738_s27 }
  0x45   : > { %p735_p10 = pnand %p733_p0, %p719_p12  ;;  %p741_p1 = scmp.lt.s32.totalorder %s739_s7, %s732_s4 }
  0x47   : > { %p736_p3 = pneg %p735_p10  ;;  %p742_p5 = por %p741_p1, %p740_p6 }
  0x49   : > { %p743_p7 = pnand %p742_p5, %p736_p3 }
  0x4b   : > { %746 = shalt.err (!%p743_p7)
}
  0x4c   : > { %s839_s18 = smov 192   ;;  %s1108_s8 = smov 64  }
  0x4d   : > { %614 = dma.hbm_to_vmem [thread:$0]  (!%p1107_p8), %s976_s10, 1024, %s981_s11, %s983_s26, %s839_s18, %s1108_s8, %s837_s19  }
  0x4e   : > { %p1109_p12 = scmp.ne.s32.totalorder %s1104_s25, 0 }
  0x4f   : > { %p1110_p2 = scmp.ne.s32.totalorder (!%p1109_p12), %s1099_s20, 0 }
  0x50   : > { %215 = sbr.rel (%p1109_p12) target bundleno = 359 (0x167), region = 32 }
  0x57   : > { %800 = dma.done.wait (%p1110_p2), [#allocation4], 128  }
  0x58   : > { %802 = vsyncadd (%p1110_p2), [#allocation4], 4294967168  ;;  %s1020_s28 = sand.u32 1, %s817_s13   ;;  %p1111_p9 = scmp.ne.s32.totalorder %s1101_s22, 0 }
  0x59   : > { %s545_s29 = sshll.u32 %s1020_s28, 6  ;;  %s222_s6 = scalar_lea.sflag [#allocation7], %s1020_s28 }
  0x5a   : > { %s225_s9 = scalar_lea.vmem [#allocation6], %s545_s29 }
  0x5b   : > { %804 = dma.done.wait (%p1111_p9), %s222_s6, 1024  }
  0x5c   : > { %806 = vsyncadd (%p1111_p9), %s222_s6, 4294966272  ;;  %v840_v0 = vmov 0.0   ;;  %vm841_vm0 = vmmov 0   ;;  %v680_v1 = vld [vmem:[%s225_s9] sm:$0xff]   ;;  %v681_v2 = vld [vmem:[%s225_s9 + $0x8] sm:$0xff]   ;;  %p253_p8 = scmp.lt.s32.totalorder %s825_s15, 2 }
  0x5d   : > { %579 = vmatprep.subr.bf16.mxu0 %v840_v0  ;;  %595 = vmatprep.mubr.msk.bf16.mxu0 %vm841_vm0, %v840_v0  ;;  %v682_v3 = vld [vmem:[%s225_s9 + $0x10] sm:$0xff]   ;;  %v683_v4 = vld [vmem:[%s225_s9 + $0x18] sm:$0xff]   ;;  %v684_v5 = vld [vmem:[%s225_s9 + $0x20] sm:$0xff]   ;;  %s546_s22 = sshll.u32 %s1020_s28, 3  ;;  %s560_s4 = sshll.u32 %s825_s15, 6 }
  0x5e   : > { %580 = vmatpush3.bf16.msra.mxu0 %v680_v1  ;;  %v685_v6 = vld [vmem:[%s225_s9 + $0x28] sm:$0xff]   ;;  %v686_v7 = vld [vmem:[%s225_s9 + $0x30] sm:$0xff]   ;;  %v687_v8 = vld [vmem:[%s225_s9 + $0x38] sm:$0xff]   ;;  %s254_s20 = scalar_select %p253_p8, %s825_s15, 2 }
  0x5f   : > { %581 = vmatprep.subr.bf16.mxu0 %v840_v0  ;;  %v688_v9 = vld [vmem:[#allocation3] sm:$0xff]   ;;  %s250_s11 = scalar_lea.vmem [#allocation8], %s546_s22  ;;  %s1040_s7 = scalar_lea.hbm %s1091_s3, %s560_s4 }
  0x60   : > { %s255_s10 = scalar_lea.vmem %s1090_s2, %s254_s20  ;;  %s423_s26 = sshll.u32 %s250_s11, 4  ;;  %s1035_s26 = int_to_ptr.vmem [resolvable:$true] %s423_s26 }
  0x61   : > { %v556_v11 = vld [vmem:[%s255_s10] ss:$0 sm:$0xff]  ;;  %s408_s18 = scalar_lea.sflag [#allocation5], %s1020_s28  ;;  %s747_s8 = scalar_lea.vmem %s1035_s26, 128 }
  0x62   : > { %582 = vmatpush3.bf16.msra.mxu0 %v681_v2  ;;  %p748_p11 = scmp.ne.s32.totalorder %s1035_s26, %s747_s8  ;;  %p1112_p4 = scmp.ne.s32.totalorder %s1102_s23, 0 }
  0x63   : > { %583 = vmatprep.subr.bf16.mxu0 %v840_v0  ;;  %s842_s15 = smov [#allocation8]  }
  0x64   : > { %p749_p13 = pnand %p748_p11, %p1112_p4  ;;  %s751_s29 = sshll.u32 %s842_s15, 4  ;;  %s752_s29 = int_to_ptr.vmem [resolvable:$false] %s751_s29 }
  0x65   : > { %s753_s6 = scalar_lea.vmem %s752_s29, 256  ;;  %p754_p10 = scmp.lt.s32.totalorder %s1035_s26, %s752_s29 }
  0x66   : > { %584 = vmatpush3.bf16.msra.mxu0 %v682_v3  ;;  %p750_p0 = pneg %p749_p13  ;;  %p755_p3 = scmp.lt.s32.totalorder %s753_s6, %s747_s8 }
  0x67   : > { %585 = vmatprep.subr.bf16.mxu0 %v840_v0 }
  0x68   : > { %p756_p6 = por %p755_p3, %p754_p10 }
  0x6a   : > { %586 = vmatpush3.bf16.msra.mxu0 %v683_v4  ;;  %p757_p1 = pnand %p756_p6, %p750_p0 }
  0x6b   : > { %587 = vmatprep.subr.bf16.mxu0 %v840_v0 }
  0x6e   : > { %588 = vmatpush3.bf16.msra.mxu0 %v684_v5 }
  0x6f   : > { %589 = vmatprep.subr.bf16.mxu0 %v840_v0 }
  0x72   : > { %590 = vmatpush3.bf16.msra.mxu0 %v685_v6 }
  0x73   : > { %591 = vmatprep.subr.bf16.mxu0 %v840_v0 }
  0x76   : > { %592 = vmatpush3.bf16.msra.mxu0 %v686_v7 }
  0x77   : > { %593 = vmatprep.subr.bf16.mxu0 %v840_v0 }
  0x7a   : > { %594 = vmatpush3.bf16.msra.mxu0 %v687_v8 }
  0x7d   : > { %596 = vmatmul.mubr.bf16.vlgmr.msra.gmra.mrb[0].mxu0 %v688_v9 }
 0x150   : > { %v372_v10 = vpop.f32.mrb[0].mxu0 }
 0x151   : > { %v597_v12 = vpop.f32.mrb[1].mxu0  ;;  %v395_v14 = vadd.f32 %v556_v11, %v372_v10 }
 0x152   : > { %v375_v13 = vpop.f32.mrb[2].mxu0 }
 0x153   : > { %v396_v15 = vadd.f32 %v556_v11, %v375_v13  ;;  %v598_v16 = vpop.f32.mrb[3].mxu0 }
 0x155   : > { %v568_v17 = vpack.c.bf16 %v396_v15, %v395_v14 }
 0x157   : > { %569 = vst [vmem:[%s250_s11] sm:$0xff] %v568_v17  }
 0x158   : > { %760 = shalt.err (!%p757_p1)
}
 0x159   : > { %s761_s9 = scalar_lea.hbm %s1040_s7, 128  ;;  %s765_s25 = scalar_lea.hbm %s1091_s3, 384 }
 0x15a   : > { %p762_p5 = scmp.ne.s32.totalorder %s1040_s7, %s761_s9  ;;  %p766_p2 = scmp.lt.u32.totalorder %s1040_s7, %s1091_s3 }
 0x15b   : > { %p767_p9 = scmp.lt.u32.totalorder %s765_s25, %s761_s9  ;;  %p769_p11 = scmp.lt.u32.totalorder %s761_s9, %s1040_s7 }
 0x15c   : > { %p763_p7 = pnand %p762_p5, %p1112_p4 }
 0x15d   : > { %p768_p8 = por %p767_p9, %p766_p2 }
 0x15e   : > { %p764_p12 = pneg %p763_p7 }
 0x15f   : > { %p770_p13 = por %p769_p11, %p768_p8 }
 0x161   : > { %p771_p0 = pnand %p770_p13, %p764_p12 }
 0x163   : > { %774 = shalt.err (!%p771_p0)
}
 0x164   : > { %s843_s11 = smov 64   ;;  %s844_s4 = smov 192  }
 0x165   : > { %s845_s5 = smov 4  }
 0x166   : > { %605 = dma.vmem_to_hbm [thread:$0]  (%p1112_p4), %s1035_s26, 128, %s1040_s7, %s408_s18, %s843_s11, %s844_s4, %s845_s5  }
 0x167 PF: > { %p622_p10 = scmp.ge.s32.totalorder %s833_s17, 2  ;;  %s438_s27 = sand.u32 1, %s813_s12  }
 0x168   : > { %p1113_p3 = scmp.ne.s32.totalorder %s1103_s24, 0  ;;  %s439_s8 = scalar_lea.sflag [#allocation5], %s438_s27 }
 0x16a   : > { %p616_p6 = pnand %p622_p10, %p1113_p3 }
 0x16c   : > { %808 = dma.done.wait (!%p616_p6), %s439_s8, 128  }
 0x16d   : > { %810 = vsyncadd (!%p616_p6), %s439_s8, 4294967168  ;;  %s20_s17 = sadd.s32 1, %s833_s17   ;;  %s1114_s12 = smov %s817_s13 }
 0x16e   : > { %p17_p1 = scmp.ge.s32.totalorder %s20_s17, 5   ;;  %s1115_s13 = smov %s821_s14 }
 0x16f   : > { %s1116_s14 = smov %s979_s21  ;;  %s1117_s15 = smov %s829_s16 }
 0x170   : > { %s1118_s16 = smov %s1120_s30  ;;  %19 = sbr.rel (!%p17_p1) target bundleno = 7 (0x7), region = 94 }
 0x177   :  { %444 = vsyncpa [#allocation4], 1 }
 0x178   :  { %446 = vsyncpa [#allocation4 + $0x1], 1 }
 0x179   :  { %447 = vsyncpa [#allocation7], 1 }
 0x17a   :  { %449 = vsyncpa [#allocation7 + $0x1], 1 }
 0x17b   :  { %450 = vsyncpa [#allocation5], 1 }
 0x17c   :  { %452 = vsyncpa [#allocation5 + $0x1], 1 }

</bundles_post_ra>
